<compile_context>
chip_gen: v6e
topology: v6e:2x2x1
jax: 0.10.0
libtpu: 0.0.40
codegen_flags: <defaults>
</compile_context>

<pallas_src>
import functools

import jax
import jax.numpy as jnp
from jax import lax
from jax.experimental import pallas as pl
from jax.experimental.pallas import tpu as pltpu

BN_EPS = 1e-5
LANE = 128  # lane width: hidden feature dims are padded to a multiple of this


def _round_up(n, m):
    return ((n + m - 1) // m) * m


# ---------------------------------------------------------------------------
# Single fused Pallas kernel for the whole MLP
# ---------------------------------------------------------------------------
def _make_fused_kernel(n_hidden, has_mid, inv_b):
    """Kernel ref layout (n_hidden >= 1):
         x, w0, [w_mid_stack], w_last, bgb_stack, b_last, o
       For n_hidden == 0 (single Linear): x, w_last, b_last, o."""

    def bias_relu_bn(h, bgb_rows):
        # bgb_rows: (3, N) = [bias; gamma; beta] for this layer.
        b_row = bgb_rows[0:1, :]
        g_row = bgb_rows[1:2, :]
        beta_row = bgb_rows[2:3, :]
        # Linear bias + ReLU
        h = jnp.maximum(h + b_row, 0.0)
        # BatchNorm1d training mode: biased batch stats, centered-variance form
        # (PyTorch parity); sums scaled by precomputed 1/B (no divides).
        mean = jnp.sum(h, axis=0, keepdims=True) * inv_b
        c = h - mean
        var = jnp.sum(c * c, axis=0, keepdims=True) * inv_b
        # Row-level (1, N) math; rsqrt lands on the EUP.
        scale = g_row * lax.rsqrt(var + BN_EPS)
        shift = beta_row - mean * scale
        # Only 2 full-(B, N) VPU ops in the epilogue.
        return h * scale + shift

    def kernel(*refs):
        x_ref, o_ref = refs[0], refs[-1]
        if n_hidden == 0:
            w_last_ref, b_last_ref = refs[1], refs[2]
            h = x_ref[...]
        else:
            idx = 1
            w0_ref = refs[idx]
            idx += 1
            w_mid_ref = None
            if has_mid:
                w_mid_ref = refs[idx]
                idx += 1
            w_last_ref, bgb_ref, b_last_ref = refs[idx], refs[idx + 1], refs[idx + 2]

            h = jnp.dot(x_ref[...], w0_ref[...], preferred_element_type=jnp.float32)
            h = bias_relu_bn(h, bgb_ref[0])
            for i in range(n_hidden - 1):
                h = jnp.dot(h, w_mid_ref[i], preferred_element_type=jnp.float32)
                h = bias_relu_bn(h, bgb_ref[i + 1])

        y = jnp.dot(h, w_last_ref[...], preferred_element_type=jnp.float32)
        o_ref[...] = (y + b_last_ref[...]).astype(o_ref.dtype)

    return kernel


# ---------------------------------------------------------------------------
# Parameter construction (PyTorch-style init) + one-time layout preparation
# ---------------------------------------------------------------------------
def init_linear_net(key, net_struct, dtype=jnp.float32):
    """Mimics nn.Linear default init (U[-1/sqrt(fan_in), +1/sqrt(fan_in)])
    and nn.BatchNorm1d affine init (gamma=1, beta=0)."""
    params = []
    for i in range(len(net_struct) - 1):
        fan_in, fan_out = net_struct[i], net_struct[i + 1]
        key, kw, kb = jax.random.split(key, 3)
        bound = 1.0 / jnp.sqrt(jnp.float32(fan_in))
        w = jax.random.uniform(kw, (fan_out, fan_in), dtype, -bound, bound)
        b = jax.random.uniform(kb, (fan_out,), dtype, -bound, bound)
        gamma = jnp.ones((fan_out,), dtype)
        beta = jnp.zeros((fan_out,), dtype)
        params.append((w, b, gamma, beta))
    return params


def prepare_params(params, net_struct):
    """One-time layout prep (never re-done per forward):
       w0      : (in_features, H_pad)        K natural, N lane-padded
       w_mid   : (n_mid, H_pad, H_pad)       stacked middle weights
       w_last  : (H_pad, out_features)       N natural -> direct (B, out) store
       bgb     : (n_hidden, 3, H_pad)        stacked bias / gamma / beta rows
       b_last  : (1, out_features)
    Padded rows/cols are zero, so padded activation columns stay exactly zero
    through every Linear / ReLU / BN and never perturb the logical math."""
    net_struct = tuple(net_struct)
    n_layers = len(params)
    n_hidden = n_layers - 1
    dtype = params[0][0].dtype
    out_f = net_struct[-1]

    if n_hidden == 0:  # single Linear layer
        w, b, _, _ = params[0]
        return {"w_last": jnp.asarray(w.T), "b_last": jnp.asarray(b).reshape(1, out_f)}

    h_pad = _round_up(max(net_struct[1:-1]), LANE)

    # First layer: K natural (no 128 K-pad), N padded.
    w0_raw, _, _, _ = params[0]
    w0 = jnp.zeros((net_struct[0], h_pad), dtype).at[:, : net_struct[1]].set(w0_raw.T)

    # Middle layers (1 .. n_hidden-1): all (H_pad, H_pad), stacked.
    mids = []
    for li in range(1, n_hidden):
        w, _, _, _ = params[li]
        fan_out, fan_in = w.shape
        mids.append(jnp.zeros((h_pad, h_pad), dtype).at[:fan_in, :fan_out].set(w.T))

    # Stacked bias / gamma / beta for every hidden (ReLU+BN) layer.
    bgb = jnp.zeros((n_hidden, 3, h_pad), dtype)
    for li in range(n_hidden):
        _, b, g, beta = params[li]
        n = b.shape[0]
        bgb = bgb.at[li, 0, :n].set(b)
        bgb = bgb.at[li, 1, :n].set(g)
        bgb = bgb.at[li, 2, :n].set(beta)

    # Final layer: K padded to H_pad, N natural.
    w_l, b_l, _, _ = params[-1]
    fan_out, fan_in = w_l.shape
    w_last = jnp.zeros((h_pad, fan_out), dtype).at[:fan_in, :].set(w_l.T)
    b_last = jnp.asarray(b_l).reshape(1, fan_out)

    prepped = {"w0": w0, "w_last": w_last, "bgb": bgb, "b_last": b_last}
    if mids:
        prepped["w_mid"] = jnp.stack(mids)
    return prepped


# ---------------------------------------------------------------------------
# Forward: one fused pallas_call for the entire network
# ---------------------------------------------------------------------------
@functools.partial(jax.jit, static_argnames=("net_struct",))
def linear_net_forward(prepped, x, *, net_struct):
    net_struct = tuple(net_struct)
    n_layers = len(net_struct) - 1
    n_hidden = n_layers - 1
    B = x.shape[0]
    out_f = net_struct[-1]
    has_mid = "w_mid" in prepped

    if n_hidden == 0:
        flat_inputs = [x, prepped["w_last"], prepped["b_last"]]
    else:
        flat_inputs = [x, prepped["w0"]]
        if has_mid:
            flat_inputs.append(prepped["w_mid"])
        flat_inputs += [prepped["w_last"], prepped["bgb"], prepped["b_last"]]

    # Size scoped VMEM to the actual resident footprint (+ headroom for the
    # live intermediate activations / compiler temps).
    in_bytes = sum(int(a.size) * a.dtype.itemsize for a in flat_inputs)
    out_bytes = B * out_f * x.dtype.itemsize
    vmem_limit = min(2 * (in_bytes + out_bytes) + (2 << 20), 64 << 20)

    vmem = pl.BlockSpec(memory_space=pltpu.MemorySpace.VMEM)
    return pl.pallas_call(
        _make_fused_kernel(n_hidden, has_mid, 1.0 / B),
        out_shape=jax.ShapeDtypeStruct((B, out_f), x.dtype),
        in_specs=[vmem] * len(flat_inputs),
        out_specs=vmem,
        compiler_params=pltpu.CompilerParams(vmem_limit_bytes=int(vmem_limit)),
    )(*flat_inputs)


# ---------------------------------------------------------------------------
# Pure-JAX reference (mirrors the PyTorch module in training mode)
# ---------------------------------------------------------------------------
def reference_forward(params, x):
    h = x
    for i in range(len(params) - 1):
        w, b, g, beta = params[i]
        h = jnp.maximum(h @ w.T + b, 0.0)
        mean = jnp.mean(h, axis=0, keepdims=True)
        var = jnp.mean((h - mean) ** 2, axis=0, keepdims=True)
        h = (h - mean) / jnp.sqrt(var + BN_EPS) * g + beta
    w, b, _, _ = params[-1]
    return h @ w.T + b


# ---------------------------------------------------------------------------
if __name__ == "__main__":
    NetStruct = (16, 32, 32, 8)   # small MLP: 16 -> 32 -> 32 -> 8
    batch = 8

    key = jax.random.PRNGKey(0)
    key, kx = jax.random.split(key)
    x = jax.random.normal(kx, (batch, NetStruct[0]), jnp.float32)

    params = init_linear_net(key, NetStruct)
    prepped = prepare_params(params, NetStruct)   # one-time layout prep

    y = linear_net_forward(prepped, x, net_struct=NetStruct)
    y = jax.block_until_ready(y)

    assert y.shape == (batch, NetStruct[-1]), y.shape
    assert bool(jnp.all(jnp.isfinite(y)))
    y_ref = reference_forward(params, x)
    assert bool(jnp.allclose(y, y_ref, rtol=1e-2, atol=1e-2)), float(
        jnp.max(jnp.abs(y - y_ref)))
    print("KERNEL_OK")
</pallas_src>

<mosaic_0001>
module attributes {stable_mosaic.version = 11 : i64} {
  func.func @kernel(%arg0: memref<8x16xf32, #tpu.memory_space<vmem>>, %arg1: memref<16x128xf32, #tpu.memory_space<vmem>>, %arg2: memref<1x128x128xf32, #tpu.memory_space<vmem>>, %arg3: memref<128x8xf32, #tpu.memory_space<vmem>>, %arg4: memref<2x3x128xf32, #tpu.memory_space<vmem>>, %arg5: memref<1x8xf32, #tpu.memory_space<vmem>>, %arg6: memref<8x8xf32, #tpu.memory_space<vmem>>) attributes {dimension_semantics = [], scalar_prefetch = 0 : i64, scratch_operands = 0 : i64, tpu.core_type = #tpu.core_type<tc>} {
    %c0 = arith.constant 0 : index
    %c0_0 = arith.constant 0 : index
    %0 = vector.load %arg0[%c0, %c0_0] : memref<8x16xf32, #tpu.memory_space<vmem>>, vector<8x16xf32>
    %c0_1 = arith.constant 0 : index
    %c0_2 = arith.constant 0 : index
    %1 = vector.load %arg1[%c0_1, %c0_2] : memref<16x128xf32, #tpu.memory_space<vmem>>, vector<16x128xf32>
    %cst = arith.constant dense<0.000000e+00> : vector<8x128xf32>
    %2 = tpu.matmul %0, %1, %cst {dimension_numbers = #tpu.dot_dimension_numbers<[1], [0], [0], [1], [0, 0, 1, 1], [], []>} : vector<8x16xf32>, vector<16x128xf32>, vector<8x128xf32> -> vector<8x128xf32>
    %c0_3 = arith.constant 0 : index
    %c0_4 = arith.constant 0 : index
    %c0_5 = arith.constant 0 : index
    %3 = vector.load %arg4[%c0_3, %c0_4, %c0_5] : memref<2x3x128xf32, #tpu.memory_space<vmem>>, vector<1x3x128xf32>
    %4 = vector.shape_cast %3 : vector<1x3x128xf32> to vector<3x128xf32>
    %5 = vector.extract_strided_slice %4 {offsets = [0, 0], sizes = [1, 128], strides = [1, 1]} : vector<3x128xf32> to vector<1x128xf32>
    %6 = vector.extract_strided_slice %4 {offsets = [1, 0], sizes = [1, 128], strides = [1, 1]} : vector<3x128xf32> to vector<1x128xf32>
    %7 = vector.extract_strided_slice %4 {offsets = [2, 0], sizes = [1, 128], strides = [1, 1]} : vector<3x128xf32> to vector<1x128xf32>
    %8 = vector.broadcast %5 : vector<1x128xf32> to vector<8x128xf32>
    %9 = arith.addf %2, %8 : vector<8x128xf32>
    %cst_6 = arith.constant 0.000000e+00 : f32
    %10 = vector.broadcast %cst_6 : f32 to vector<8x128xf32>
    %11 = arith.maximumf %9, %10 : vector<8x128xf32>
    %cst_7 = arith.constant dense<0.000000e+00> : vector<128xf32>
    %12 = vector.multi_reduction <add>, %11, %cst_7 [0] : vector<8x128xf32> to vector<128xf32>
    %13 = vector.shape_cast %12 : vector<128xf32> to vector<1x128xf32>
    %cst_8 = arith.constant 1.250000e-01 : f32
    %14 = vector.broadcast %cst_8 : f32 to vector<1x128xf32>
    %15 = arith.mulf %13, %14 : vector<1x128xf32>
    %16 = vector.broadcast %15 : vector<1x128xf32> to vector<8x128xf32>
    %17 = arith.subf %11, %16 : vector<8x128xf32>
    %18 = arith.mulf %17, %17 : vector<8x128xf32>
    %cst_9 = arith.constant dense<0.000000e+00> : vector<128xf32>
    %19 = vector.multi_reduction <add>, %18, %cst_9 [0] : vector<8x128xf32> to vector<128xf32>
    %20 = vector.shape_cast %19 : vector<128xf32> to vector<1x128xf32>
    %cst_10 = arith.constant 1.250000e-01 : f32
    %21 = vector.broadcast %cst_10 : f32 to vector<1x128xf32>
    %22 = arith.mulf %20, %21 : vector<1x128xf32>
    %cst_11 = arith.constant 9.99999974E-6 : f32
    %23 = vector.broadcast %cst_11 : f32 to vector<1x128xf32>
    %24 = arith.addf %22, %23 : vector<1x128xf32>
    %25 = math.rsqrt %24 : vector<1x128xf32>
    %26 = arith.mulf %6, %25 : vector<1x128xf32>
    %27 = arith.mulf %15, %26 : vector<1x128xf32>
    %28 = arith.subf %7, %27 : vector<1x128xf32>
    %29 = vector.broadcast %26 : vector<1x128xf32> to vector<8x128xf32>
    %30 = arith.mulf %11, %29 : vector<8x128xf32>
    %31 = vector.broadcast %28 : vector<1x128xf32> to vector<8x128xf32>
    %32 = arith.addf %30, %31 : vector<8x128xf32>
    %c0_12 = arith.constant 0 : index
    %c0_13 = arith.constant 0 : index
    %c0_14 = arith.constant 0 : index
    %33 = vector.load %arg2[%c0_12, %c0_13, %c0_14] : memref<1x128x128xf32, #tpu.memory_space<vmem>>, vector<1x128x128xf32>
    %34 = vector.shape_cast %33 : vector<1x128x128xf32> to vector<128x128xf32>
    %cst_15 = arith.constant dense<0.000000e+00> : vector<8x128xf32>
    %35 = tpu.matmul %32, %34, %cst_15 {dimension_numbers = #tpu.dot_dimension_numbers<[1], [0], [0], [1], [0, 0, 1, 1], [], []>} : vector<8x128xf32>, vector<128x128xf32>, vector<8x128xf32> -> vector<8x128xf32>
    %c1 = arith.constant 1 : index
    %c0_16 = arith.constant 0 : index
    %c0_17 = arith.constant 0 : index
    %36 = vector.load %arg4[%c1, %c0_16, %c0_17] : memref<2x3x128xf32, #tpu.memory_space<vmem>>, vector<1x3x128xf32>
    %37 = vector.shape_cast %36 : vector<1x3x128xf32> to vector<3x128xf32>
    %38 = vector.extract_strided_slice %37 {offsets = [0, 0], sizes = [1, 128], strides = [1, 1]} : vector<3x128xf32> to vector<1x128xf32>
    %39 = vector.extract_strided_slice %37 {offsets = [1, 0], sizes = [1, 128], strides = [1, 1]} : vector<3x128xf32> to vector<1x128xf32>
    %40 = vector.extract_strided_slice %37 {offsets = [2, 0], sizes = [1, 128], strides = [1, 1]} : vector<3x128xf32> to vector<1x128xf32>
    %41 = vector.broadcast %38 : vector<1x128xf32> to vector<8x128xf32>
    %42 = arith.addf %35, %41 : vector<8x128xf32>
    %cst_18 = arith.constant 0.000000e+00 : f32
    %43 = vector.broadcast %cst_18 : f32 to vector<8x128xf32>
    %44 = arith.maximumf %42, %43 : vector<8x128xf32>
    %cst_19 = arith.constant dense<0.000000e+00> : vector<128xf32>
    %45 = vector.multi_reduction <add>, %44, %cst_19 [0] : vector<8x128xf32> to vector<128xf32>
    %46 = vector.shape_cast %45 : vector<128xf32> to vector<1x128xf32>
    %cst_20 = arith.constant 1.250000e-01 : f32
    %47 = vector.broadcast %cst_20 : f32 to vector<1x128xf32>
    %48 = arith.mulf %46, %47 : vector<1x128xf32>
    %49 = vector.broadcast %48 : vector<1x128xf32> to vector<8x128xf32>
    %50 = arith.subf %44, %49 : vector<8x128xf32>
    %51 = arith.mulf %50, %50 : vector<8x128xf32>
    %cst_21 = arith.constant dense<0.000000e+00> : vector<128xf32>
    %52 = vector.multi_reduction <add>, %51, %cst_21 [0] : vector<8x128xf32> to vector<128xf32>
    %53 = vector.shape_cast %52 : vector<128xf32> to vector<1x128xf32>
    %cst_22 = arith.constant 1.250000e-01 : f32
    %54 = vector.broadcast %cst_22 : f32 to vector<1x128xf32>
    %55 = arith.mulf %53, %54 : vector<1x128xf32>
    %cst_23 = arith.constant 9.99999974E-6 : f32
    %56 = vector.broadcast %cst_23 : f32 to vector<1x128xf32>
    %57 = arith.addf %55, %56 : vector<1x128xf32>
    %58 = math.rsqrt %57 : vector<1x128xf32>
    %59 = arith.mulf %39, %58 : vector<1x128xf32>
    %60 = arith.mulf %48, %59 : vector<1x128xf32>
    %61 = arith.subf %40, %60 : vector<1x128xf32>
    %62 = vector.broadcast %59 : vector<1x128xf32> to vector<8x128xf32>
    %63 = arith.mulf %44, %62 : vector<8x128xf32>
    %64 = vector.broadcast %61 : vector<1x128xf32> to vector<8x128xf32>
    %65 = arith.addf %63, %64 : vector<8x128xf32>
    %c0_24 = arith.constant 0 : index
    %c0_25 = arith.constant 0 : index
    %66 = vector.load %arg3[%c0_24, %c0_25] : memref<128x8xf32, #tpu.memory_space<vmem>>, vector<128x8xf32>
    %cst_26 = arith.constant dense<0.000000e+00> : vector<8x8xf32>
    %67 = tpu.matmul %65, %66, %cst_26 {dimension_numbers = #tpu.dot_dimension_numbers<[1], [0], [0], [1], [0, 0, 1, 1], [], []>} : vector<8x128xf32>, vector<128x8xf32>, vector<8x8xf32> -> vector<8x8xf32>
    %c0_27 = arith.constant 0 : index
    %c0_28 = arith.constant 0 : index
    %68 = vector.load %arg5[%c0_27, %c0_28] : memref<1x8xf32, #tpu.memory_space<vmem>>, vector<1x8xf32>
    %69 = vector.broadcast %68 : vector<1x8xf32> to vector<8x8xf32>
    %70 = arith.addf %67, %69 : vector<8x8xf32>
    %c0_29 = arith.constant 0 : index
    %c0_30 = arith.constant 0 : index
    %71 = vector.load %arg6[%c0_29, %c0_30] : memref<8x8xf32, #tpu.memory_space<vmem>>, vector<8x8xf32>
    tpu.vector_store %arg6[%c0_29, %c0_30], %70 {strides = array<i32>} : memref<8x8xf32, #tpu.memory_space<vmem>>, vector<8x8xf32>,
    return
  }
}

</mosaic_0001>

<bundles_post_ra>
// kernel: linear_net_forward.1
= control target key start
LH: loop header
LB: loop body
LE: loop exit
PB: predicated region body
PF: predicated region fallthrough
CT: control target
= control target key end

     0   :  { %v523_v1 = vmov 0.0   ;;  %vm524_vm0 = vmmov 0   ;;  %s732_s0 = inlined_call_operand.vmem [shape: f32[8,16], index: 0, kind: input, shape index: {}]   ;;  %s733_s1 = inlined_call_operand.vmem [shape: f32[16,128], index: 1, kind: input, shape index: {}]   ;;  %s734_s2 = inlined_call_operand.vmem [shape: f32[1,128,128], index: 2, kind: input, shape index: {}]   ;;  %s735_s3 = inlined_call_operand.vmem [shape: f32[128,8], index: 3, kind: input, shape index: {}]   ;;  %s736_s4 = inlined_call_operand.vmem [shape: f32[2,3,128], index: 4, kind: input, shape index: {}]   ;;  %s737_s5 = inlined_call_operand.vmem [shape: f32[1,8], index: 5, kind: input, shape index: {}]   ;;  %s738_s6 = inlined_call_operand.hbm [shape: f32[8,8], index: 6, kind: output, shape index: {}]  }
   0x1   :  { %v26_v0 = vld [vmem:[%s733_s1 + $0x8] sm:$0xff]  ;;  %417 = vmatprep.subr.mxu0 %v523_v1  ;;  %v25_v2 = vld [vmem:[%s733_s1] sm:$0xff]  ;;  %421 = vmatprep.mubr.msk.f32.mxu0 %vm524_vm0, %v523_v1 }
   0x2   :  { %11 = vsyncpa [#allocation3], 0  ;;  %418 = vmatpush3.msra.mxu0 %v26_v0  ;;  %v24_v3 = vld [vmem:[%s732_s0] sm:$0xff]  ;;  %vm32_vm1 = vcmask 130048   ;;  %424 = vmatprep.subr.mxu1 %v523_v1  ;;  %v156_v4 = vld [vmem:[%s734_s2 + $0x78] sm:$0xff]  ;;  %v28_v20 = vlaneseq  ;;  %s525_s15 = smov [#allocation2]  }
   0x3   :  { %419 = vmatprep.subr.mxu0 %v523_v1  ;;  %456 = vmatprep.mubr.msk.f32.mxu1 %vm524_vm0, %v523_v1  ;;  %v155_v5 = vld [vmem:[%s734_s2 + $0x70] sm:$0xff]  ;;  %v154_v6 = vld [vmem:[%s734_s2 + $0x68] sm:$0xff]  ;;  %v153_v7 = vld [vmem:[%s734_s2 + $0x60] sm:$0xff]  ;;  %s369_s16 = sshll.u32 %s525_s15, 4  ;;  %vm361_vm2 = vcmask 64512   ;;  %s370_s16 = int_to_ptr.vmem [resolvable:$true] %s369_s16 }
   0x4   :  { %420 = vmatpush3.msra.mxu0 %v25_v2  ;;  %425 = vmatpush3.msra.mxu1 %v156_v4  ;;  %v152_v8 = vld [vmem:[%s734_s2 + $0x58] sm:$0xff]  ;;  %v151_v9 = vld [vmem:[%s734_s2 + $0x50] sm:$0xff]  ;;  %v150_v10 = vld [vmem:[%s734_s2 + $0x48] sm:$0xff]  ;;  %v640_v21 = vshrl.u32 %v28_v20, 7  ;;  %s501_s17 = scalar_lea.vmem %s370_s16, 128  ;;  %p506_p1 = scmp.lt.s32.totalorder %s370_s16, %s370_s16 }
   0x5   :  { %422 = vmatmul.mubr.msk.f32.vlgmr.msra.gmra.mxu0 %vm32_vm1, %v24_v3  ;;  %459 = vmatprep.subr.mxu0 %v523_v1  ;;  %v149_v11 = vld [vmem:[%s734_s2 + $0x40] sm:$0xff]  ;;  %v148_v12 = vld [vmem:[%s734_s2 + $0x38] sm:$0xff]  ;;  %v147_v13 = vld [vmem:[%s734_s2 + $0x30] sm:$0xff]  ;;  %p502_p0 = scmp.ne.s32.totalorder %s370_s16, %s501_s17  ;;  %p507_p2 = scmp.lt.s32.totalorder %s501_s17, %s501_s17 }
   0x6   :  { %491 = vmatprep.mubr.msk.f32.mxu0 %vm524_vm0, %v523_v1  ;;  %426 = vmatprep.subr.mxu1 %v523_v1  ;;  %v146_v14 = vld [vmem:[%s734_s2 + $0x28] sm:$0xff]  ;;  %v145_v15 = vld [vmem:[%s734_s2 + $0x20] sm:$0xff]  ;;  %v144_v16 = vld [vmem:[%s734_s2 + $0x18] sm:$0xff]  ;;  %v30_v22 = vsub.s32 0, %v640_v21  ;;  %v133_v48 = vsub.s32 1, %v640_v21  ;;  %v138_v52 = vsub.s32 2, %v640_v21 }
   0x7   :  { %427 = vmatpush3.msra.mxu1 %v155_v5  ;;  %v143_v17 = vld [vmem:[%s734_s2 + $0x10] sm:$0xff]  ;;  %v142_v18 = vld [vmem:[%s734_s2 + $0x8] sm:$0xff]  ;;  %v141_v19 = vld [vmem:[%s734_s2] sm:$0xff]  ;;  %p508_p3 = por %p507_p2, %p506_p1 }
   0x8   :  { %428 = vmatprep.subr.mxu1 %v523_v1  ;;  %v27_v23 = vld [vmem:[%s736_s4] sm:$0x7]  ;;  %v283_v57 = vld [vmem:[%s735_s3 + $0x78] sm:$0xff]  ;;  %v282_v58 = vld [vmem:[%s735_s3 + $0x70] sm:$0xff] }
   0x9   :  { %429 = vmatpush3.msra.mxu1 %v154_v6  ;;  %v31_v24 = vrot.slane %v27_v23, %v30_v22  ;;  %460 = vmatpush3.msra.mxu0 %v283_v57  ;;  %v281_v59 = vld [vmem:[%s735_s3 + $0x68] sm:$0xff]  ;;  %v280_v60 = vld [vmem:[%s735_s3 + $0x60] sm:$0xff]  ;;  %v279_v61 = vld [vmem:[%s735_s3 + $0x58] sm:$0xff]  ;;  %p509_p4 = pnand %p508_p3, %p502_p0 }
   0xa   :  { %430 = vmatprep.subr.mxu1 %v523_v1  ;;  %461 = vmatprep.subr.mxu0 %v523_v1  ;;  %v278_v62 = vld [vmem:[%s735_s3 + $0x50] sm:$0xff]  ;;  %v277_v63 = vld [vmem:[%s735_s3 + $0x48] sm:$0xff]  ;;  %v276_v0 = vld [vmem:[%s735_s3 + $0x40] sm:$0xff] }
   0xb   :  { %431 = vmatpush3.msra.mxu1 %v153_v7  ;;  %462 = vmatpush3.msra.mxu0 %v282_v58  ;;  %v275_v2 = vld [vmem:[%s735_s3 + $0x38] sm:$0xff]  ;;  %v274_v3 = vld [vmem:[%s735_s3 + $0x30] sm:$0xff]  ;;  %v273_v4 = vld [vmem:[%s735_s3 + $0x28] sm:$0xff] }
   0xc   :  { %432 = vmatprep.subr.mxu1 %v523_v1  ;;  %463 = vmatprep.subr.mxu0 %v523_v1  ;;  %v272_v5 = vld [vmem:[%s735_s3 + $0x20] sm:$0xff]  ;;  %v271_v6 = vld [vmem:[%s735_s3 + $0x18] sm:$0xff]  ;;  %v270_v7 = vld [vmem:[%s735_s3 + $0x10] sm:$0xff] }
   0xd   :  { %433 = vmatpush3.msra.mxu1 %v152_v8  ;;  %464 = vmatpush3.msra.mxu0 %v281_v59  ;;  %v269_v8 = vld [vmem:[%s735_s3 + $0x8] sm:$0xff] }
   0xe   :  { %434 = vmatprep.subr.mxu1 %v523_v1  ;;  %465 = vmatprep.subr.mxu0 %v523_v1 }
   0xf   :  { %435 = vmatpush3.msra.mxu1 %v151_v9  ;;  %466 = vmatpush3.msra.mxu0 %v280_v60  ;;  %v268_v9 = vld [vmem:[%s735_s3] sm:$0xff] }
  0x10   :  { %436 = vmatprep.subr.mxu1 %v523_v1  ;;  %467 = vmatprep.subr.mxu0 %v523_v1 }
  0x11   :  { %437 = vmatpush3.msra.mxu1 %v150_v10  ;;  %468 = vmatpush3.msra.mxu0 %v279_v61  ;;  %v378_v10 = vld [vmem:[%s736_s4 + $0x4] sm:$0x7] }
  0x12   :  { %438 = vmatprep.subr.mxu1 %v523_v1  ;;  %469 = vmatprep.subr.mxu0 %v523_v1 }
  0x13   :  { %439 = vmatpush3.msra.mxu1 %v149_v11  ;;  %470 = vmatpush3.msra.mxu0 %v278_v62  ;;  %v162_v11 = vrot.slane %v378_v10, %v30_v22 }
  0x14   :  { %440 = vmatprep.subr.mxu1 %v523_v1  ;;  %471 = vmatprep.subr.mxu0 %v523_v1 }
  0x15   :  { %441 = vmatpush3.msra.mxu1 %v148_v12  ;;  %472 = vmatpush3.msra.mxu0 %v277_v63 }
  0x16   :  { %442 = vmatprep.subr.mxu1 %v523_v1  ;;  %473 = vmatprep.subr.mxu0 %v523_v1 }
  0x17   :  { %443 = vmatpush3.msra.mxu1 %v147_v13  ;;  %474 = vmatpush3.msra.mxu0 %v276_v0 }
  0x18   :  { %444 = vmatprep.subr.mxu1 %v523_v1  ;;  %475 = vmatprep.subr.mxu0 %v523_v1 }
  0x19   :  { %445 = vmatpush3.msra.mxu1 %v146_v14  ;;  %476 = vmatpush3.msra.mxu0 %v275_v2 }
  0x1a   :  { %446 = vmatprep.subr.mxu1 %v523_v1  ;;  %477 = vmatprep.subr.mxu0 %v523_v1 }
  0x1b   :  { %447 = vmatpush3.msra.mxu1 %v145_v15  ;;  %478 = vmatpush3.msra.mxu0 %v274_v3 }
  0x1c   :  { %448 = vmatprep.subr.mxu1 %v523_v1  ;;  %479 = vmatprep.subr.mxu0 %v523_v1 }
  0x1d   :  { %449 = vmatpush3.msra.mxu1 %v144_v16  ;;  %480 = vmatpush3.msra.mxu0 %v273_v4 }
  0x1e   :  { %450 = vmatprep.subr.mxu1 %v523_v1  ;;  %481 = vmatprep.subr.mxu0 %v523_v1 }
  0x1f   :  { %451 = vmatpush3.msra.mxu1 %v143_v17  ;;  %482 = vmatpush3.msra.mxu0 %v272_v5 }
  0x20   :  { %452 = vmatprep.subr.mxu1 %v523_v1  ;;  %483 = vmatprep.subr.mxu0 %v523_v1 }
  0x21   :  { %453 = vmatpush3.msra.mxu1 %v142_v18  ;;  %484 = vmatpush3.msra.mxu0 %v271_v6 }
  0x22   :  { %454 = vmatprep.subr.mxu1 %v523_v1  ;;  %485 = vmatprep.subr.mxu0 %v523_v1 }
  0x23   :  { %455 = vmatpush3.msra.mxu1 %v141_v19  ;;  %486 = vmatpush3.msra.mxu0 %v270_v7 }
  0x24   :  { %487 = vmatprep.subr.mxu0 %v523_v1 }
  0x25   :  { %488 = vmatpush3.msra.mxu0 %v269_v8 }
  0x26   :  { %489 = vmatprep.subr.mxu0 %v523_v1 }
  0x27   :  { %490 = vmatpush3.msra.mxu0 %v268_v9 }
  0xc5   :  { %v102_v25 = vpop.f32.mrf.mxu0 }
  0xc6   :  { %v103_v26 = vadd.f32 %v102_v25, %v31_v24 }
  0xc7   :  { %v423_v27 = vpop.f32.mrf.mxu0 }
  0xc8   :  { %v106_v28 = vmax.f32 %v103_v26, 0.0 }
  0xca   :  { %v107_v29 = vrot.slane %v106_v28, 4 }
  0xcc   :  { %v108_v30 = vadd.f32 %v107_v29, %v106_v28 }
  0xce   :  { %v109_v31 = vrot.slane %v108_v30, 2 }
  0xd0   :  { %v110_v32 = vadd.f32 %v109_v31, %v108_v30 }
  0xd2   :  { %v111_v33 = vrot.slane %v110_v32, 1 }
  0xd4   :  { %v112_v34 = vadd.f32 %v111_v33, %v110_v32 }
  0xd6   :  { %v113_v35 = vmul.f32 0.125, %v112_v34 }
  0xd8   :  { %v114_v36 = vsub.f32 %v106_v28, %v113_v35 }
  0xda   :  { %v115_v37 = vmul.f32 %v114_v36, %v114_v36 }
  0xdc   :  { %v116_v38 = vrot.slane %v115_v37, 4 }
  0xde   :  { %v117_v39 = vadd.f32 %v116_v38, %v115_v37 }
  0xe0   :  { %v118_v40 = vrot.slane %v117_v39, 2 }
  0xe2   :  { %v119_v41 = vadd.f32 %v118_v40, %v117_v39 }
  0xe4   :  { %v120_v42 = vrot.slane %v119_v41, 1 }
  0xe6   :  { %v121_v43 = vadd.f32 %v120_v42, %v119_v41  ;;  %v379_v42 = vld [vmem:[%s737_s5] ss:$0 sm:$0xff] }
  0xe8   :  { %v122_v44 = vmul.f32 0.125, %v121_v43 }
  0xea   :  { %v123_v45 = vadd.f32 1e-05, %v122_v44 }
  0xec   :  { %497 = vrsqrt.f32 %v123_v45 }
  0xf9   :  { %v498_v46 = vpop.eup %497 }
  0xfa   :  { %v125_v47 = vmul.f32 %v498_v46, %v27_v23 }
  0xfc   :  { %v126_v49 = vmul.f32 %v125_v47, %v113_v35  ;;  %v134_v51 = vrot.slane %v125_v47, %v133_v48 }
  0xfe   :  { %v128_v50 = vrot.slane %v126_v49, 7  ;;  %v135_v54 = vmul.f32 %v134_v51, %v106_v28 }
 0x100   :  { %v130_v53 = vsub.f32 %v27_v23, %v128_v50 }
 0x102   :  { %v139_v55 = vrot.slane %v130_v53, %v138_v52 }
 0x104   :  { %v140_v56 = vadd.f32 %v139_v55, %v135_v54 }
 0x106   :  { %457 = vmatmul.mubr.f32.vlgmr.msra.gmra.mxu1 %v140_v56 }
 0x1c6   :  { %v229_v12 = vpop.f32.mrf.mxu1 }
 0x1c7   :  { %v230_v13 = vadd.f32 %v229_v12, %v162_v11 }
 0x1c8   :  { %v458_v14 = vpop.f32.mrf.mxu1 }
 0x1c9   :  { %v233_v15 = vmax.f32 %v230_v13, 0.0 }
 0x1cb   :  { %v234_v16 = vrot.slane %v233_v15, 4 }
 0x1cd   :  { %v235_v17 = vadd.f32 %v234_v16, %v233_v15 }
 0x1cf   :  { %v236_v18 = vrot.slane %v235_v17, 2 }
 0x1d1   :  { %v237_v19 = vadd.f32 %v236_v18, %v235_v17 }
 0x1d3   :  { %v238_v20 = vrot.slane %v237_v19, 1 }
 0x1d5   :  { %v239_v23 = vadd.f32 %v238_v20, %v237_v19 }
 0x1d7   :  { %v240_v24 = vmul.f32 0.125, %v239_v23 }
 0x1d9   :  { %v241_v1 = vsub.f32 %v233_v15, %v240_v24 }
 0x1db   :  { %v242_v25 = vmul.f32 %v241_v1, %v241_v1 }
 0x1dd   :  { %v243_v26 = vrot.slane %v242_v25, 4 }
 0x1df   :  { %v244_v27 = vadd.f32 %v243_v26, %v242_v25 }
 0x1e1   :  { %v245_v28 = vrot.slane %v244_v27, 2 }
 0x1e3   :  { %v246_v29 = vadd.f32 %v245_v28, %v244_v27 }
 0x1e5   :  { %v247_v30 = vrot.slane %v246_v29, 1 }
 0x1e7   :  { %v248_v31 = vadd.f32 %v247_v30, %v246_v29 }
 0x1e9   :  { %v249_v22 = vmul.f32 0.125, %v248_v31 }
 0x1eb   :  { %v250_v32 = vadd.f32 1e-05, %v249_v22 }
 0x1ed   :  { %499 = vrsqrt.f32 %v250_v32 }
 0x1fa   :  { %v500_v33 = vpop.eup %499 }
 0x1fb   :  { %v252_v34 = vmul.f32 %v500_v33, %v378_v10 }
 0x1fd   :  { %v253_v35 = vmul.f32 %v252_v34, %v240_v24  ;;  %v261_v37 = vrot.slane %v252_v34, %v133_v48 }
 0x1ff   :  { %v255_v36 = vrot.slane %v253_v35, 7  ;;  %v262_v39 = vmul.f32 %v261_v37, %v233_v15 }
 0x201   :  { %v257_v38 = vsub.f32 %v378_v10, %v255_v36 }
 0x203   :  { %v266_v40 = vrot.slane %v257_v38, %v138_v52 }
 0x205   :  { %v267_v41 = vadd.f32 %v266_v40, %v262_v39 }
 0x207   :  { %492 = vmatmul.mubr.f32.vlgmr.msra.gmra.mxu0 %v267_v41 }
 0x2c7   :  { %v357_v43 = vpop.f32.mrf.mxu0 }
 0x2c8   :  { %v358_v44 = vadd.f32 %v379_v42, %v357_v43 }
 0x2c9   :  { %v493_v45 = vpop.f32.mrf.mxu0 }
 0x2ca   :  { %362 = vst.msk [vmem:[#allocation2] sm:$0xff] %vm361_vm2, %v358_v44 }
 0x2cb   :  { %512 = shalt.err (!%p509_p4)
}
 0x2cc   :  { %372 = dma.vmem_to_hbm [thread:$0]  %s370_s16, 128, %s738_s6, [#allocation3]  }
 0x2cd   :  { %521 = dma.done.wait [#allocation3], 128  }
 0x2ce   :  { %522 = vsyncadd [#allocation3], 4294967168 }
 0x2cf   :  { %376 = vsyncpa [#allocation3], 1 }

</bundles_post_ra>
